<compile_context>
chip_gen: v7x
topology: tpu7x:2x2x1
jax: 0.10.0
libtpu: 0.0.40
codegen_flags: <defaults>
</compile_context>

<pallas_src>
import functools

import jax
import jax.numpy as jnp
from jax.experimental import pallas as pl
from jax.experimental.pallas import tpu as pltpu

K_NEG = 5  # number of negatives per anchor (hard-coded `5` in the PyTorch code)


def _n_pair_loss_kernel(a_ref, p_ref, n_ref, out_ref, *, n_total):
    tile_n, e = a_ref.shape

    a = a_ref[...].astype(jnp.float32)                     # (T, E)
    p = p_ref[...].astype(jnp.float32)                     # (T, E)

    ap = jnp.sum(a * p, axis=-1, keepdims=True)            # (T, 1)  <a_i, p_i>

    # x_k = <a, n_k> - <a, p>.  The K negatives of anchor row r occupy lanes
    # [k*E, (k+1)*E) of row r: static, lane-contiguous slices of a dense slab.
    xs = []
    for k in range(K_NEG):
        nk = n_ref[:, k * e:(k + 1) * e].astype(jnp.float32)      # (T, E)
        xs.append(jnp.sum(a * nk, axis=-1, keepdims=True) - ap)   # (T, 1)
    x = jnp.concatenate(xs, axis=-1)                        # (T, K) fused logits

    # Stable log(1 + sum_k exp(x_k)) = t + log(exp(-t) + sum_k exp(x_k - t)),
    # with t = max(0, max_k x_k) so exp(-t) never overflows.
    t = jnp.maximum(jnp.max(x, axis=-1, keepdims=True), 0.0)          # (T, 1)
    z = jnp.exp(-t) + jnp.sum(jnp.exp(x - t), axis=-1, keepdims=True)  # (T, 1)
    lse = t + jnp.log(z)                                    # (T, 1)

    # Per-row L2 term: sum_e (a^2 + p^2); divided by N outside the kernel.
    l2 = jnp.sum(a * a + p * p, axis=-1, keepdims=True)     # (T, 1)

    # Mask padded rows of the boundary tile (their block contents are garbage).
    row = (jax.lax.broadcasted_iota(jnp.int32, (tile_n, 1), 0)
           + pl.program_id(0) * tile_n)
    valid = row < n_total
    lse_sum = jnp.sum(jnp.where(valid, lse, 0.0), keepdims=True)   # (1, 1)
    l2_sum = jnp.sum(jnp.where(valid, l2, 0.0), keepdims=True)     # (1, 1)

    # One dense f32 vreg per tile: sublane 0 carries lse_sum, sublanes 1..7 l2_sum.
    sub = jax.lax.broadcasted_iota(jnp.int32, (8, 128), 0)
    out_ref[...] = jnp.where(sub == 0, lse_sum, l2_sum)     # (8, 128)


def _round_up(x, m):
    return (x + m - 1) // m * m


def _vmem_caps():
    """Generation-aware VMEM working-set budget / scoped limit cap."""
    try:
        cap = int(pltpu.get_tpu_info().vmem_capacity_bytes)
    except Exception:
        cap = 64 << 20  # conservative fallback (v7x per-TensorCore VMEM)
    limit_cap = min(cap // 2, 56 << 20)   # 56 MiB on 128-MiB parts, 32 MiB on v7x
    budget = limit_cap - (8 << 20)        # double-buffered working-set target
    return budget, limit_cap


def _pick_tile_n(n, e, itemsize, budget):
    """Biggest tile_n that fits the budget, with real (padded) accounting."""
    e_pad = _round_up(e, 128)                    # lane padding in VMEM
    ke_pad = _round_up(K_NEG * e, 128)
    in_row = (2 * e_pad + ke_pad) * itemsize     # a + p + negatives, one buffer copy
    tmp_row = 4 * e_pad * 4                      # in-kernel fp32 cast/product temps
    per_row = 2 * in_row + tmp_row               # double-buffered inputs + temps
    t = max(8, min(2048, (budget // per_row) // 8 * 8))
    t = min(t, _round_up(n, 8))
    if n > 8:                                    # >=2 tiles so both v7x TCs get work
        t = min(t, _round_up((n + 1) // 2, 8))
    return int(t), int(per_row)


def n_plus_1_loss(anchors, positives, negatives, l2_reg=0.02, *, tile_n=None):
    """anchors, positives: (N, E); negatives: (N*K_NEG, E).  Returns a scalar."""
    n, e = anchors.shape
    assert positives.shape == (n, e)
    assert negatives.shape == (n * K_NEG, e)

    # Free view: row i of (N, K*E) holds the K negatives of anchor i back to
    # back along the feature (lane) axis.  Mirrors the PyTorch
    # `[negatives[i*5:(i+1)*5] for i in range(n)]` + stack, with no data movement.
    neg = negatives.reshape(n, K_NEG * e)

    itemsize = jnp.dtype(anchors.dtype).itemsize
    budget, limit_cap = _vmem_caps()
    auto_tile, per_row = _pick_tile_n(n, e, itemsize, budget)
    if tile_n is None:
        tile_n = auto_tile
    num_tiles = pl.cdiv(n, tile_n)

    footprint = tile_n * per_row + (1 << 20)     # + misc (outputs, (T,K) temps)
    vmem_limit = int(max(16 << 20, min(limit_cap, footprint + (8 << 20))))

    cost = pl.CostEstimate(
        flops=2 * n * e * (K_NEG + 2),
        transcendentals=n * (K_NEG + 2),
        bytes_accessed=(2 + K_NEG) * n * e * itemsize + num_tiles * 8 * 128 * 4,
    )

    kernel = functools.partial(_n_pair_loss_kernel, n_total=n)

    parts = pl.pallas_call(
        kernel,
        out_shape=jax.ShapeDtypeStruct((num_tiles, 8, 128), jnp.float32),
        grid_spec=pltpu.PrefetchScalarGridSpec(
            num_scalar_prefetch=0,
            grid=(num_tiles,),
            in_specs=[
                pl.BlockSpec((tile_n, e), lambda i: (i, 0)),
                pl.BlockSpec((tile_n, e), lambda i: (i, 0)),
                pl.BlockSpec((tile_n, K_NEG * e), lambda i: (i, 0)),
            ],
            out_specs=pl.BlockSpec((None, 8, 128), lambda i: (i, 0, 0)),
        ),
        compiler_params=pltpu.CompilerParams(
            dimension_semantics=("parallel",),
            vmem_limit_bytes=vmem_limit,
        ),
        cost_estimate=cost,
    )(anchors, positives, neg)

    # Tiny O(num_tiles) epilogue in XLA.
    lse_total = jnp.sum(parts[:, 0, 0])
    l2_total = jnp.sum(parts[:, 1, 0])
    return lse_total / n + jnp.float32(l2_reg) * (l2_total / n)


def _reference(anchors, positives, negatives, l2_reg=0.02):
    """Pure-JAX transcription of the PyTorch module (VPU-exact f32, no MXU)."""
    n, e = anchors.shape
    a = anchors.astype(jnp.float32)
    p = positives.astype(jnp.float32)
    neg = negatives.reshape(n, K_NEG, e).astype(jnp.float32)
    x = jnp.sum(a[:, None, :] * (neg - p[:, None, :]), axis=-1)   # (n, K)
    npair = jnp.mean(jnp.log1p(jnp.sum(jnp.exp(x), axis=-1)))
    l2 = jnp.sum(a * a + p * p) / n
    return npair + l2_reg * l2


if __name__ == "__main__":
    key = jax.random.PRNGKey(0)

    # Case 1: lane-dense E (kernel sweet spot), multi-tile grid.
    # Case 2: small E and ragged N (exercises boundary-tile row masking).
    for (n, e) in [(16, 128), (10, 32)]:
        k1, k2, k3, key = jax.random.split(key, 4)
        anchors = jax.random.normal(k1, (n, e), dtype=jnp.float32)
        positives = jax.random.normal(k2, (n, e), dtype=jnp.float32)
        negatives = jax.random.normal(k3, (n * K_NEG, e), dtype=jnp.float32)

        loss = n_plus_1_loss(anchors, positives, negatives, l2_reg=0.02)
        loss = jax.block_until_ready(loss)

        ref = _reference(anchors, positives, negatives, l2_reg=0.02)
        assert jnp.allclose(loss, ref, rtol=1e-5, atol=1e-5), ((n, e), loss, ref)

    print("KERNEL_OK")
</pallas_src>

<mosaic_0001>
module attributes {stable_mosaic.version = 11 : i64} {
  func.func @_n_pair_loss_kernel(%arg0: i32, %arg1: memref<8x128xf32, #tpu.memory_space<vmem>>, %arg2: memref<8x128xf32, #tpu.memory_space<vmem>>, %arg3: memref<8x640xf32, #tpu.memory_space<vmem>>, %arg4: memref<1x8x128xf32, #tpu.memory_space<vmem>>) attributes {dimension_semantics = [#tpu.dimension_semantics<parallel>], iteration_bounds = array<i64: 2>, scalar_prefetch = 0 : i64, scratch_operands = 0 : i64, tpu.core_type = #tpu.core_type<tc>, window_params = [{transform_indices = @transform_0, window_bounds = array<i64: 8, 128>}, {transform_indices = @transform_1, window_bounds = array<i64: 8, 128>}, {transform_indices = @transform_2, window_bounds = array<i64: 8, 640>}, {transform_indices = @transform_3, window_bounds = array<i64: 1, 8, 128>}]} {
    %c0 = arith.constant 0 : index
    %c0_0 = arith.constant 0 : index
    %0 = vector.load %arg1[%c0, %c0_0] : memref<8x128xf32, #tpu.memory_space<vmem>>, vector<8x128xf32>
    %c0_1 = arith.constant 0 : index
    %c0_2 = arith.constant 0 : index
    %1 = vector.load %arg2[%c0_1, %c0_2] : memref<8x128xf32, #tpu.memory_space<vmem>>, vector<8x128xf32>
    %2 = arith.mulf %0, %1 : vector<8x128xf32>
    %cst = arith.constant dense<0.000000e+00> : vector<8xf32>
    %3 = vector.multi_reduction <add>, %2, %cst [1] : vector<8x128xf32> to vector<8xf32>
    %4 = vector.shape_cast %3 : vector<8xf32> to vector<8x1xf32>
    %c0_3 = arith.constant 0 : index
    %c0_4 = arith.constant 0 : index
    %5 = vector.load %arg3[%c0_3, %c0_4] : memref<8x640xf32, #tpu.memory_space<vmem>>, vector<8x128xf32>
    %6 = arith.mulf %0, %5 : vector<8x128xf32>
    %cst_5 = arith.constant dense<0.000000e+00> : vector<8xf32>
    %7 = vector.multi_reduction <add>, %6, %cst_5 [1] : vector<8x128xf32> to vector<8xf32>
    %8 = vector.shape_cast %7 : vector<8xf32> to vector<8x1xf32>
    %9 = arith.subf %8, %4 : vector<8x1xf32>
    %c0_6 = arith.constant 0 : index
    %c128 = arith.constant 128 : index
    %10 = vector.load %arg3[%c0_6, %c128] : memref<8x640xf32, #tpu.memory_space<vmem>>, vector<8x128xf32>
    %11 = arith.mulf %0, %10 : vector<8x128xf32>
    %cst_7 = arith.constant dense<0.000000e+00> : vector<8xf32>
    %12 = vector.multi_reduction <add>, %11, %cst_7 [1] : vector<8x128xf32> to vector<8xf32>
    %13 = vector.shape_cast %12 : vector<8xf32> to vector<8x1xf32>
    %14 = arith.subf %13, %4 : vector<8x1xf32>
    %c0_8 = arith.constant 0 : index
    %c256 = arith.constant 256 : index
    %15 = vector.load %arg3[%c0_8, %c256] : memref<8x640xf32, #tpu.memory_space<vmem>>, vector<8x128xf32>
    %16 = arith.mulf %0, %15 : vector<8x128xf32>
    %cst_9 = arith.constant dense<0.000000e+00> : vector<8xf32>
    %17 = vector.multi_reduction <add>, %16, %cst_9 [1] : vector<8x128xf32> to vector<8xf32>
    %18 = vector.shape_cast %17 : vector<8xf32> to vector<8x1xf32>
    %19 = arith.subf %18, %4 : vector<8x1xf32>
    %c0_10 = arith.constant 0 : index
    %c384 = arith.constant 384 : index
    %20 = vector.load %arg3[%c0_10, %c384] : memref<8x640xf32, #tpu.memory_space<vmem>>, vector<8x128xf32>
    %21 = arith.mulf %0, %20 : vector<8x128xf32>
    %cst_11 = arith.constant dense<0.000000e+00> : vector<8xf32>
    %22 = vector.multi_reduction <add>, %21, %cst_11 [1] : vector<8x128xf32> to vector<8xf32>
    %23 = vector.shape_cast %22 : vector<8xf32> to vector<8x1xf32>
    %24 = arith.subf %23, %4 : vector<8x1xf32>
    %c0_12 = arith.constant 0 : index
    %c512 = arith.constant 512 : index
    %25 = vector.load %arg3[%c0_12, %c512] : memref<8x640xf32, #tpu.memory_space<vmem>>, vector<8x128xf32>
    %26 = arith.mulf %0, %25 : vector<8x128xf32>
    %cst_13 = arith.constant dense<0.000000e+00> : vector<8xf32>
    %27 = vector.multi_reduction <add>, %26, %cst_13 [1] : vector<8x128xf32> to vector<8xf32>
    %28 = vector.shape_cast %27 : vector<8xf32> to vector<8x1xf32>
    %29 = arith.subf %28, %4 : vector<8x1xf32>
    %30 = tpu.concatenate %9, %14, %19, %24, %29 in 1 : vector<8x1xf32>, vector<8x1xf32>, vector<8x1xf32>, vector<8x1xf32>, vector<8x1xf32> -> vector<8x5xf32>
    %cst_14 = arith.constant dense<0xFF800000> : vector<8xf32>
    %31 = vector.multi_reduction <maximumf>, %30, %cst_14 [1] : vector<8x5xf32> to vector<8xf32>
    %32 = vector.shape_cast %31 : vector<8xf32> to vector<8x1xf32>
    %cst_15 = arith.constant 0.000000e+00 : f32
    %33 = vector.broadcast %cst_15 : f32 to vector<8x1xf32>
    %34 = arith.maximumf %32, %33 : vector<8x1xf32>
    %cst_16 = arith.constant 0.000000e+00 : f32
    %35 = vector.broadcast %cst_16 : f32 to vector<8x1xf32>
    %36 = arith.subf %35, %34 : vector<8x1xf32>
    %37 = math.exp %36 : vector<8x1xf32>
    %38 = vector.broadcast %34 : vector<8x1xf32> to vector<8x5xf32>
    %39 = arith.subf %30, %38 : vector<8x5xf32>
    %40 = math.exp %39 : vector<8x5xf32>
    %cst_17 = arith.constant dense<0.000000e+00> : vector<8xf32>
    %41 = vector.multi_reduction <add>, %40, %cst_17 [1] : vector<8x5xf32> to vector<8xf32>
    %42 = vector.shape_cast %41 : vector<8xf32> to vector<8x1xf32>
    %43 = arith.addf %37, %42 : vector<8x1xf32>
    %44 = math.log %43 : vector<8x1xf32>
    %45 = arith.addf %34, %44 : vector<8x1xf32>
    %46 = arith.mulf %0, %0 : vector<8x128xf32>
    %47 = arith.mulf %1, %1 : vector<8x128xf32>
    %48 = arith.addf %46, %47 : vector<8x128xf32>
    %cst_18 = arith.constant dense<0.000000e+00> : vector<8xf32>
    %49 = vector.multi_reduction <add>, %48, %cst_18 [1] : vector<8x128xf32> to vector<8xf32>
    %50 = vector.shape_cast %49 : vector<8xf32> to vector<8x1xf32>
    %51 = tpu.iota {dimensions = array<i32: 0>} : vector<8x1xi32>
    %c8_i32 = arith.constant 8 : i32
    %52 = arith.muli %arg0, %c8_i32 : i32
    %53 = vector.broadcast %52 : i32 to vector<8x1xi32>
    %54 = arith.addi %51, %53 : vector<8x1xi32>
    %c16_i32 = arith.constant 16 : i32
    %55 = vector.broadcast %c16_i32 : i32 to vector<8x1xi32>
    %56 = arith.cmpi slt, %54, %55 : vector<8x1xi32>
    %cst_19 = arith.constant 0.000000e+00 : f32
    %57 = vector.broadcast %cst_19 : f32 to vector<8x1xf32>
    %58 = arith.select %56, %45, %57 : vector<8x1xi1>, vector<8x1xf32>
    %59 = vector.shape_cast %58 : vector<8x1xf32> to vector<1x8x1xf32>
    %cst_20 = arith.constant dense<0.000000e+00> : vector<1xf32>
    %60 = vector.multi_reduction <add>, %59, %cst_20 [1, 2] : vector<1x8x1xf32> to vector<1xf32>
    %61 = vector.shape_cast %60 : vector<1xf32> to vector<1x1x1xf32>
    %62 = vector.extract %61[0, 0, 0] : f32 from vector<1x1x1xf32>
    %63 = vector.broadcast %62 : f32 to vector<1x1xf32>
    %cst_21 = arith.constant 0.000000e+00 : f32
    %64 = vector.broadcast %cst_21 : f32 to vector<8x1xf32>
    %65 = arith.select %56, %50, %64 : vector<8x1xi1>, vector<8x1xf32>
    %66 = vector.shape_cast %65 : vector<8x1xf32> to vector<1x8x1xf32>
    %cst_22 = arith.constant dense<0.000000e+00> : vector<1xf32>
    %67 = vector.multi_reduction <add>, %66, %cst_22 [1, 2] : vector<1x8x1xf32> to vector<1xf32>
    %68 = vector.shape_cast %67 : vector<1xf32> to vector<1x1x1xf32>
    %69 = vector.extract %68[0, 0, 0] : f32 from vector<1x1x1xf32>
    %70 = vector.broadcast %69 : f32 to vector<1x1xf32>
    %71 = tpu.iota {dimensions = array<i32: 0>} : vector<8x128xi32>
    %c0_i32 = arith.constant 0 : i32
    %72 = vector.broadcast %c0_i32 : i32 to vector<8x128xi32>
    %73 = arith.cmpi eq, %71, %72 : vector<8x128xi32>
    %74 = vector.shape_cast %63 : vector<1x1xf32> to vector<1x1xf32>
    %75 = vector.broadcast %74 : vector<1x1xf32> to vector<8x128xf32>
    %76 = vector.shape_cast %70 : vector<1x1xf32> to vector<1x1xf32>
    %77 = vector.broadcast %76 : vector<1x1xf32> to vector<8x128xf32>
    %78 = arith.select %73, %75, %77 : vector<8x128xi1>, vector<8x128xf32>
    %c0_23 = arith.constant 0 : index
    %c0_24 = arith.constant 0 : index
    %c0_25 = arith.constant 0 : index
    %79 = vector.load %arg4[%c0_23, %c0_24, %c0_25] : memref<1x8x128xf32, #tpu.memory_space<vmem>>, vector<1x8x128xf32>
    %80 = vector.shape_cast %79 : vector<1x8x128xf32> to vector<8x128xf32>
    %81 = vector.shape_cast %78 : vector<8x128xf32> to vector<1x8x128xf32>
    tpu.vector_store %arg4[%c0_23, %c0_24, %c0_25], %81 {strides = array<i32>} : memref<1x8x128xf32, #tpu.memory_space<vmem>>, vector<1x8x128xf32>,
    return
  }
  func.func @transform_0(%arg0: i32) -> (i32, i32) {
    %c0_i32 = arith.constant 0 : i32
    %c0_i32_0 = arith.constant 0 : i32
    return %arg0, %c0_i32 : i32, i32
  }
  func.func @transform_1(%arg0: i32) -> (i32, i32) {
    %c0_i32 = arith.constant 0 : i32
    %c0_i32_0 = arith.constant 0 : i32
    return %arg0, %c0_i32 : i32, i32
  }
  func.func @transform_2(%arg0: i32) -> (i32, i32) {
    %c0_i32 = arith.constant 0 : i32
    %c0_i32_0 = arith.constant 0 : i32
    return %arg0, %c0_i32 : i32, i32
  }
  func.func @transform_3(%arg0: i32) -> (i32, i32, i32) {
    %c0_i32 = arith.constant 0 : i32
    %c0_i32_0 = arith.constant 0 : i32
    %c0_i32_1 = arith.constant 0 : i32
    return %arg0, %c0_i32, %c0_i32_0 : i32, i32, i32
  }
}

</mosaic_0001>

<bundles_post_ra>
// kernel: tpu_custom_call.1
= control target key start
LH: loop header
LB: loop body
LE: loop exit
PB: predicated region body
PF: predicated region fallthrough
CT: control target
= control target key end

     0   :  { %s991_s0 = inlined_call_operand.hbm [shape: f32[16,128], index: 0, kind: input, shape index: {}]   ;;  %s992_s1 = inlined_call_operand.hbm [shape: f32[16,128], index: 1, kind: input, shape index: {}]   ;;  %s993_s2 = inlined_call_operand.hbm [shape: f32[16,640], index: 2, kind: input, shape index: {}]   ;;  %s994_s3 = inlined_call_operand.hbm [shape: f32[2,8,128], index: 3, kind: output, shape index: {}]  }
   0x1   :  { %998 = sst [smem:[#allocation13_spill]] %s991_s0 }
   0x2   :  { %999 = sst [smem:[#allocation14_spill]] %s992_s1 }
   0x3   :  { %8 = vsyncpa [#allocation3], 0 }
   0x4   :  { %10 = vsyncpa [#allocation3 + $0x1], 0 }
   0x5   :  { %11 = vsyncpa [#allocation6], 0 }
   0x6   :  { %13 = vsyncpa [#allocation6 + $0x1], 0 }
   0x7   :  { %14 = vsyncpa [#allocation4], 0 }
   0x8   :  { %16 = vsyncpa [#allocation4 + $0x1], 0  ;;  %s751_s12 = smov 0   ;;  %s753_s13 = smov 0  }
   0x9   :  { %s755_s14 = smov 0   ;;  %s757_s15 = smov 0  }
   0xa LB: > { %s772_s16 = sadd.s32 4294967295, %s725_s15   ;;  %s479_s17 = sadd.s32 4294967294, %s725_s15   ;;  %s725_s15 = sphi %s757_s15, %s1020_s15   ;;  %s721_s14 = sphi %s755_s14, %s1019_s14   ;;  %s717_s13 = sphi %s753_s13, %s1018_s13   ;;  %s713_s12 = sphi %s751_s12, %s1017_s12  }
   0xb   : > { %s776_s18 = sadd.s32 1, %s725_s15   ;;  %s29_s19 = sadd.s32 1, %s721_s14 }
   0xc   : > { %s26_s20 = ssub.s32 %s725_s15, %s776_s18  ;;  %p36_p0 = scmp.ne.s32.totalorder %s721_s14, %s717_s13 }
   0xd   : > { %p27_p1 = scmp.eq.s32.totalorder %s26_s20, 0  ;;  %p37_p2 = scmp.eq.s32.totalorder %s725_s15, 0 }
   0xe   : > { %p42_p3 = scmp.ne.s32.totalorder %s717_s13, %s713_s12  ;;  %p43_p4 = scmp.eq.s32.totalorder %s772_s16, 0 }
   0xf   : > { %s788_s21 = scalar_select %p27_p1, %s721_s14, %s29_s19  }
  0x10   : > { %p38_p5 = por %p37_p2, %p36_p0  ;;  %p790_p6 = por %p43_p4, %p42_p3 }
  0x11   : > { %1000 = sst [smem:[#allocation12_spill]] %s788_s21  ;;  %p118_p7 = scmp.eq.s32.totalorder %s772_s16, 1 }
  0x12   : > { %s1001_s22 = scalar_select %p790_p6, 1, 0 }
  0x13   : > { %p124_p8 = scmp.eq.s32.totalorder %s479_s17, 1  ;;  %p525_p10 = scmp.lt.s32.totalorder %s725_s15, 2 }
  0x14   : > { %p797_p11 = por %p118_p7, %p36_p0  ;;  %s806_s25 = sand.u32 1, %s721_s14  }
  0x15   : > { %p801_p12 = por %p124_p8, %p42_p3  ;;  %s483_s26 = sshll.u32 %s725_s15, 7 }
  0x16   : > { %s1002_s23 = scalar_select %p797_p11, 1, 0 }
  0x17   : > { %s1003_s24 = scalar_select %p801_p12, 1, 0 }
  0x18   : > { %s482_s27 = sshll.u32 %s806_s25, 3  ;;  %p810_p13 = pnand %p525_p10, %p38_p5 }
  0x19   : > { %s162_s29 = sand.u32 1, %s725_s15   ;;  %s1005_s1 = sld [smem:[#allocation14_spill]] }
  0x1a   : > { %s1004_s28 = scalar_select %p810_p13, 1, 0 }
  0x1b   : > { %s166_s6 = scalar_lea.vmem [#allocation5], %s482_s27  ;;  %s827_s8 = scalar_lea.sflag [#allocation6], %s162_s29 }
  0x1c   : > { %s173_s7 = sshll.u32 %s166_s6, 4  ;;  %p833_p2 = pneg %p810_p13  ;;  %s824_s7 = int_to_ptr.vmem [resolvable:$true] %s173_s7 }
  0x1f   : > { %s820_s5 = scalar_lea.hbm %s1005_s1, %s483_s26  ;;  %s570_s19 = scalar_lea.hbm %s1005_s1, 256 }
  0x20   : > { %s565_s9 = scalar_lea.hbm %s820_s5, 128  ;;  %p571_p5 = scmp.lt.u32.totalorder %s820_s5, %s1005_s1 }
  0x21   : > { %p566_p1 = scmp.ne.s32.totalorder %s820_s5, %s565_s9  ;;  %p572_p7 = scmp.lt.u32.totalorder %s570_s19, %s565_s9 }
  0x22   : > { %p574_p10 = scmp.lt.u32.totalorder %s565_s9, %s820_s5 }
  0x23   : > { %p568_p3 = pnand %p833_p2, %p566_p1  ;;  %p573_p8 = por %p572_p7, %p571_p5 }
  0x25   : > { %p569_p4 = pneg %p568_p3  ;;  %p575_p9 = por %p574_p10, %p573_p8 }
  0x27   : > { %p576_p0 = pnand %p575_p9, %p569_p4 }
  0x29   : > { %579 = shalt.err (!%p576_p0)
}
  0x2a   : > { %s580_s29 = scalar_lea.vmem %s824_s7, 128  ;;  %s727_s4 = smov [#allocation5]  }
  0x2b   : > { %p581_p1 = scmp.ne.s32.totalorder %s824_s7, %s580_s29  ;;  %s585_s6 = sshll.u32 %s727_s4, 4  ;;  %s586_s6 = int_to_ptr.vmem [resolvable:$false] %s585_s6 }
  0x2c   : > { %s587_s11 = scalar_lea.vmem %s586_s6, 256  ;;  %p588_p11 = scmp.lt.s32.totalorder %s824_s7, %s586_s6 }
  0x2d   : > { %p583_p3 = pnand %p581_p1, %p833_p2  ;;  %p589_p6 = scmp.lt.s32.totalorder %s587_s11, %s580_s29 }
  0x2f   : > { %p584_p12 = pneg %p583_p3  ;;  %p590_p5 = por %p589_p6, %p588_p11 }
  0x31   : > { %p591_p7 = pnand %p590_p5, %p584_p12 }
  0x33   : > { %594 = shalt.err (!%p591_p7)
}
  0x34   : > { %517 = dma.hbm_to_vmem [thread:$0]  (!%p810_p13), %s820_s5, 128, %s824_s7, %s827_s8  }
  0x35   : > { %p197_p9 = scmp.lt.s32.totalorder %s725_s15, 3  ;;  %s1007_s0 = sld [smem:[#allocation13_spill]] }
  0x36   : > { %p1008_p6 = scmp.ge.s32.totalorder %s725_s15, 1  ;;  %s148_s30 = scalar_lea.vmem [#allocation2], %s482_s27 }
  0x37   : > { %s155_s29 = sshll.u32 %s148_s30, 4  ;;  %s496_s5 = smul.u32 40, %s806_s25  ;;  %s873_s29 = int_to_ptr.vmem [resolvable:$true] %s155_s29 }
  0x38   : > { %p867_p11 = pnand %p1008_p6, %p197_p9  ;;  %s145_s7 = scalar_lea.sflag [#allocation3], %s806_s25 }
  0x3a   : > { %s1009_s20 = scalar_select %p867_p11, 1, 0 }
  0x3b   : > { %s863_s19 = scalar_lea.hbm %s1007_s0, %s483_s26  ;;  %s600_s11 = scalar_lea.hbm %s1007_s0, 256 }
  0x3c   : > { %s595_s4 = scalar_lea.hbm %s863_s19, 128  ;;  %p601_p8 = scmp.lt.u32.totalorder %s863_s19, %s1007_s0 }
  0x3d   : > { %p596_p12 = scmp.ne.s32.totalorder %s863_s19, %s595_s4  ;;  %p602_p10 = scmp.lt.u32.totalorder %s600_s11, %s595_s4 }
  0x3e   : > { %p604_p3 = scmp.lt.u32.totalorder %s595_s4, %s863_s19 }
  0x3f   : > { %p598_p0 = pnand %p596_p12, %p833_p2  ;;  %p603_p1 = por %p602_p10, %p601_p8 }
  0x41   : > { %p599_p4 = pneg %p598_p0  ;;  %p605_p5 = por %p604_p3, %p603_p1 }
  0x43   : > { %p606_p7 = pnand %p605_p5, %p599_p4 }
  0x45   : > { %609 = shalt.err (!%p606_p7)
}
  0x46   : > { %s610_s27 = scalar_lea.vmem %s873_s29, 128  ;;  %s728_s30 = smov [#allocation2]  }
  0x47   : > { %p611_p9 = scmp.ne.s32.totalorder %s873_s29, %s610_s27  ;;  %s615_s26 = sshll.u32 %s728_s30, 4  ;;  %s616_s26 = int_to_ptr.vmem [resolvable:$false] %s615_s26 }
  0x48   : > { %s617_s6 = scalar_lea.vmem %s616_s26, 256  ;;  %p618_p0 = scmp.lt.s32.totalorder %s873_s29, %s616_s26 }
  0x49   : > { %p613_p6 = pnand %p611_p9, %p833_p2  ;;  %p619_p11 = scmp.lt.s32.totalorder %s617_s6, %s610_s27 }
  0x4b   : > { %p614_p12 = pneg %p613_p6  ;;  %p620_p8 = por %p619_p11, %p618_p0 }
  0x4d   : > { %p621_p10 = pnand %p620_p8, %p614_p12 }
  0x4f   : > { %624 = shalt.err (!%p621_p10)
}
  0x50   : > { %514 = dma.hbm_to_vmem [thread:$0]  (!%p810_p13), %s863_s19, 128, %s873_s29, %s145_s7  }
  0x51   : > { %s497_s4 = smul.u32 640, %s725_s15  ;;  %s184_s11 = scalar_lea.vmem [#allocation7], %s496_s5 }
  0x52   : > { %s192_s9 = sshll.u32 %s184_s11, 4  ;;  %s630_s1 = scalar_lea.hbm %s993_s2, 1280  ;;  %s193_s9 = int_to_ptr.vmem [resolvable:$true] %s192_s9 }
  0x53   : > { %s190_s26 = scalar_lea.hbm %s993_s2, %s497_s4 }
  0x54   : > { %s625_s27 = scalar_lea.hbm %s190_s26, 640  ;;  %p631_p3 = scmp.lt.u32.totalorder %s190_s26, %s993_s2 }
  0x55   : > { %p626_p11 = scmp.ne.s32.totalorder %s190_s26, %s625_s27  ;;  %p632_p5 = scmp.lt.u32.totalorder %s630_s1, %s625_s27 }
  0x56   : > { %p634_p9 = scmp.lt.u32.totalorder %s625_s27, %s190_s26 }
  0x57   : > { %p628_p4 = pnand %p626_p11, %p833_p2  ;;  %p633_p7 = por %p632_p5, %p631_p3 }
  0x59   : > { %p629_p1 = pneg %p628_p4  ;;  %p635_p6 = por %p634_p9, %p633_p7 }
  0x5b   : > { %p636_p12 = pnand %p635_p6, %p629_p1 }
  0x5d   : > { %639 = shalt.err (!%p636_p12)
}
  0x5e   : > { %s640_s25 = scalar_lea.vmem %s193_s9, 640  ;;  %s729_s29 = smov [#allocation7]  }
  0x5f   : > { %p641_p0 = scmp.ne.s32.totalorder %s193_s9, %s640_s25  ;;  %s645_s5 = sshll.u32 %s729_s29, 4  ;;  %s646_s5 = int_to_ptr.vmem [resolvable:$false] %s645_s5 }
  0x60   : > { %s647_s0 = scalar_lea.vmem %s646_s5, 1280  ;;  %p648_p11 = scmp.lt.s32.totalorder %s193_s9, %s646_s5 }
  0x61   : > { %p643_p8 = pnand %p641_p0, %p833_p2  ;;  %p649_p4 = scmp.lt.s32.totalorder %s647_s0, %s640_s25 }
  0x63   : > { %p644_p10 = pneg %p643_p8  ;;  %p650_p13 = por %p649_p4, %p648_p11 }
  0x65   : > { %p651_p3 = pnand %p650_p13, %p644_p10 }
  0x67   : > { %654 = shalt.err (!%p651_p3)
}
  0x68   : > { %p1010_p5 = scmp.ne.s32.totalorder %s1004_s28, 0  ;;  %p1011_p1 = scmp.ne.s32.totalorder %s1009_s20, 0 }
  0x69   : > { %s920_s1 = sand.u32 (!%p1011_p1), 1, %s717_s13   ;;  %p1012_p13 = scmp.ne.s32.totalorder (!%p1011_p1), %s1001_s22, 0 }
  0x6a   : > { %520 = dma.hbm_to_vmem [thread:$0]  (!%p1010_p5), %s190_s26, 640, %s193_s9, %s827_s8  }
  0x6b   : > { %201 = sbr.rel (%p1011_p1) target bundleno = 820 (0x334), region = 32  ;;  %s923_s21 = sshll.u32 (!%p1011_p1), %s920_s1, 3 }
  0x6c   : > { %s204_s10 = scalar_lea.sflag (!%p1011_p1), [#allocation3], %s920_s1  ;;  %s207_s7 = scalar_lea.vmem (!%p1011_p1), [#allocation2], %s923_s21 }
  0x72   : > { %700 = dma.done.wait (%p1012_p13), %s204_s10, 128  }
  0x73   : > { %702 = vsyncadd (%p1012_p13), %s204_s10, 4294967168  ;;  %s212_s28 = sand.u32 1, %s772_s16   ;;  %s216_s20 = scalar_lea.vmem [#allocation5], %s923_s21 }
  0x74   : > { %s213_s8 = scalar_lea.sflag [#allocation6], %s212_s28 }
  0x75   : > { %704 = dma.done.wait (%p1012_p13), %s213_s8, 768  }
  0x76   : > { %706 = vsyncadd (%p1012_p13), %s213_s8, 4294966528  ;;  %s498_s4 = smul.u32 40, %s920_s1  ;;  %v258_v0 = vld [vmem:[%s207_s7] sm:$0xff]  ;;  %v259_v2 = vld [vmem:[%s216_s20] sm:$0xff]  ;;  %vm288_vm0 = vcmask 7168   ;;  %vm290_vm1 = vcmask 15360   ;;  %v319_v38 = vlaneseq }
  0x77   : > { %v260_v4 = vmul.f32 %v259_v2, %v258_v0  ;;  %vm292_vm2 = vcmask 23552   ;;  %vm294_vm3 = vcmask 31744   ;;  %vm296_vm4 = vcmask 39936   ;;  %s491_s22 = sshll.u32 %s772_s16, 3  ;;  %s493_s9 = sshll.u32 %s772_s16, 7 }
  0x78   : > { %s225_s11 = scalar_lea.vmem [#allocation7], %s498_s4  ;;  %v315_v29 = vmul.f32 %v259_v2, %v259_v2  ;;  %v314_v30 = vmul.f32 %v258_v0, %v258_v0  ;;  %v320_v39 = vshrl.u32 %v319_v38, 7  ;;  %v322_v40 = vstv %s491_s22  ;;  %s257_s17 = scalar_lea.vmem [#allocation8], %s923_s21 }
  0x79   : > { %v268_v1 = vld [vmem:[%s225_s11 + $0x8] sm:$0xff]  ;;  %v273_v5 = vld [vmem:[%s225_s11 + $0x10] sm:$0xff]  ;;  %v263_v6 = vld [vmem:[%s225_s11] sm:$0xff]  ;;  %261 = vadd.xlane.f32.xlu0 %v260_v4  ;;  %s366_s30 = sshll.u32 %s257_s17, 4  ;;  %s947_s25 = scalar_lea.hbm %s994_s3, %s493_s9  ;;  %s949_s30 = int_to_ptr.vmem [resolvable:$true] %s366_s30 }
  0x7a   : > { %v269_v3 = vmul.f32 %v268_v1, %v258_v0  ;;  %v274_v7 = vmul.f32 %v273_v5, %v258_v0  ;;  %v264_v8 = vmul.f32 %v263_v6, %v258_v0  ;;  %v283_v9 = vld [vmem:[%s225_s11 + $0x20] sm:$0xff]  ;;  %v278_v10 = vld [vmem:[%s225_s11 + $0x18] sm:$0xff]  ;;  %v316_v31 = vadd.f32 %v315_v29, %v314_v30  ;;  %s353_s16 = scalar_lea.sflag [#allocation4], %s920_s1  ;;  %s655_s29 = scalar_lea.vmem %s949_s30, 128 }
  0x7b   : > { %v284_v11 = vmul.f32 %v283_v9, %v258_v0  ;;  %v279_v12 = vmul.f32 %v278_v10, %v258_v0  ;;  %v323_v41 = vadd.s32 %v322_v40, %v320_v39  ;;  %vm347_vm6 = vcmp.eq.s32.totalorder %v320_v39, 0  ;;  %p656_p2 = scmp.ne.s32.totalorder %s949_s30, %s655_s29  ;;  %p1013_p7 = scmp.ne.s32.totalorder %s1002_s23, 0 }
  0x7c   : > { %270 = vadd.xlane.f32.xlu1 %v269_v3  ;;  %s730_s5 = smov [#allocation8]  }
  0x7d   : > { %265 = vadd.xlane.f32.xlu0 %v264_v8  ;;  %vm324_vm5 = vcmp.lt.s32.totalorder %v323_v41, 16  ;;  %p657_p9 = pnand %p656_p2, %p1013_p7  ;;  %s659_s0 = sshll.u32 %s730_s5, 4  ;;  %s660_s0 = int_to_ptr.vmem [resolvable:$false] %s659_s0 }
  0x7e   : > { %s661_s21 = scalar_lea.vmem %s660_s0, 256  ;;  %p662_p12 = scmp.lt.s32.totalorder %s949_s30, %s660_s0 }
  0x7f   : > { %p658_p6 = pneg %p657_p9  ;;  %p663_p0 = scmp.lt.s32.totalorder %s661_s21, %s655_s29 }
  0x80   : > { %275 = vadd.xlane.f32.xlu1 %v274_v7 }
  0x81   : > { %280 = vadd.xlane.f32.xlu0 %v279_v12  ;;  %p664_p8 = por %p663_p0, %p662_p12 }
  0x83   : > { %p665_p10 = pnand %p664_p8, %p658_p6 }
  0x84   : > { %285 = vadd.xlane.f32.xlu1 %v284_v11 }
 0x106   : > { %v262_v14 = vpop.xlane.xlu0 %261 }
 0x109   : > { %v271_v13 = vpop.xlane.xlu1 %270 }
 0x10a   : > { %v266_v16 = vpop.xlane.xlu0 %265  ;;  %v272_v17 = vsub.f32 %v271_v13, %v262_v14 }
 0x10b   : > { %v267_v18 = vsub.f32 %v266_v16, %v262_v14 }
 0x10d   : > { %v276_v15 = vpop.xlane.xlu1 %275  ;;  %v289_v20 = vsel %vm288_vm0, %v267_v18, %v272_v17 }
 0x10e   : > { %v277_v19 = vsub.f32 %v276_v15, %v262_v14  ;;  %v281_v22 = vpop.xlane.xlu0 %280 }
 0x10f   : > { %v282_v24 = vsub.f32 %v281_v22, %v262_v14 }
 0x110   : > { %v291_v25 = vsel %vm290_vm1, %v289_v20, %v277_v19 }
 0x111   : > { %v286_v21 = vpop.xlane.xlu1 %285  ;;  %v293_v26 = vsel %vm292_vm2, %v291_v25, %v282_v24 }
 0x112   : > { %v287_v23 = vsub.f32 %v286_v21, %v262_v14 }
 0x114   : > { %v295_v27 = vsel %vm294_vm3, %v293_v26, %v287_v23 }
 0x115   : > { %v297_v28 = vsel %vm296_vm4, %v295_v27, -inf }
 0x116   : > { %298 = vmax.xlane.f32.xlu0 %v297_v28 }
 0x11a   : > { %317 = vadd.xlane.f32.xlu0 %v316_v31 }
 0x1a3   : > { %v299_v32 = vpop.xlane.xlu0 %298 }
 0x1a4   : > { %v300_v33 = vmax.f32 %v299_v32, 0.0 }
 0x1a6   : > { %v304_v34 = vsub.f32 %v295_v27, %v300_v33  ;;  %v301_v45 = vsub.f32 0.0, %v300_v33 }
 0x1a7   : > { %v318_v42 = vpop.xlane.xlu0 %317 }
 0x1a8   : > { %v305_v35 = vmul.f32 1.442695, %v304_v34  ;;  %v336_v43 = vsel %vm324_vm5, %v318_v42, 0.0  ;;  %v302_v46 = vmul.f32 1.442695, %v301_v45 }
 0x1a9   : > { %v337_v44 = vsel %vm288_vm0, %v336_v43, 0.0 }
 0x1aa   : > { %559 = vpow2.f32 %v305_v35  ;;  %338 = vadd.xlane.f32.xlu0 %v337_v44 }
 0x1ab   : > { %561 = vpow2.f32 %v302_v46 }
 0x1b4   : > { %v560_v36 = vpop.eup %559 }
 0x1b5   : > { %v307_v37 = vsel %vm296_vm4, %v560_v36, 0.0  ;;  %v562_v47 = vpop.eup %561 }
 0x1b6   : > { %308 = vadd.xlane.f32.xlu1 %v307_v37 }
 0x237   : > { %v339_v55 = vpop.xlane.xlu0 %338 }
 0x238   : > { %v340_v56 = vrot.slane %v339_v55, 4 }
 0x23a   : > { %v341_v57 = vadd.f32 %v340_v56, %v339_v55 }
 0x23c   : > { %v342_v58 = vrot.slane %v341_v57, 2 }
 0x23e   : > { %v343_v62 = vadd.f32 %v342_v58, %v341_v57 }
 0x240   : > { %v344_v1 = vrot.slane %v343_v62, 1 }
 0x242   : > { %v345_v4 = vadd.f32 %v344_v1, %v343_v62 }
 0x243   : > { %v309_v48 = vpop.xlane.xlu1 %308 }
 0x244   : > { %v310_v49 = vadd.f32 %v562_v47, %v309_v48 }
 0x246   : > { %563 = vlog2.f32 %v310_v49 }
 0x250   : > { %v564_v50 = vpop.eup %563 }
 0x251   : > { %v312_v51 = vmul.f32 0.6931472, %v564_v50 }
 0x253   : > { %v313_v52 = vadd.f32 %v312_v51, %v300_v33 }
 0x255   : > { %v325_v53 = vsel %vm324_vm5, %v313_v52, 0.0 }
 0x256   : > { %v326_v54 = vsel %vm288_vm0, %v325_v53, 0.0 }
 0x257   : > { %327 = vadd.xlane.f32.xlu1 %v326_v54 }
 0x2e4   : > { %v328_v59 = vpop.xlane.xlu1 %327 }
 0x2e5   : > { %v329_v60 = vrot.slane %v328_v59, 4 }
 0x2e7   : > { %v330_v61 = vadd.f32 %v329_v60, %v328_v59 }
 0x2e9   : > { %v331_v63 = vrot.slane %v330_v61, 2 }
 0x2eb   : > { %v332_v0 = vadd.f32 %v331_v63, %v330_v61 }
 0x2ed   : > { %v333_v2 = vrot.slane %v332_v0, 1 }
 0x2ef   : > { %v334_v3 = vadd.f32 %v333_v2, %v332_v0 }
 0x2f1   : > { %499 = vpush %v334_v3 }
 0x2f2   : > { %501 = vpush %v345_v4 }
 0x322   : > { %s500_s26 = spop %499 }
 0x323   : > { %v348_v5 = vstv %s500_s26  ;;  %s502_s27 = spop %501 }
 0x324   : > { %v349_v6 = vstv %s502_s27 }
 0x325   : > { %v350_v7 = vsel %vm347_vm6, %v348_v5, %v349_v6 }
 0x326   : > { %351 = vst [vmem:[%s257_s17] sm:$0xff] %v350_v7 }
 0x327   : > { %668 = shalt.err (!%p665_p10)
}
 0x328   : > { %s669_s1 = scalar_lea.hbm %s947_s25, 128  ;;  %s673_s28 = scalar_lea.hbm %s994_s3, 256 }
 0x329   : > { %p670_p11 = scmp.ne.s32.totalorder %s947_s25, %s669_s1  ;;  %p674_p5 = scmp.lt.u32.totalorder %s947_s25, %s994_s3 }
 0x32a   : > { %p675_p1 = scmp.lt.u32.totalorder %s673_s28, %s669_s1  ;;  %p677_p2 = scmp.lt.u32.totalorder %s669_s1, %s947_s25 }
 0x32b   : > { %p671_p4 = pnand %p670_p11, %p1013_p7 }
 0x32c   : > { %p676_p13 = por %p675_p1, %p674_p5 }
 0x32d   : > { %p672_p3 = pneg %p671_p4 }
 0x32e   : > { %p678_p9 = por %p677_p2, %p676_p13 }
 0x330   : > { %p679_p6 = pnand %p678_p9, %p672_p3 }
 0x332   : > { %682 = shalt.err (!%p679_p6)
}
 0x333   : > { %509 = dma.vmem_to_hbm [thread:$0]  (%p1013_p7), %s949_s30, 128, %s947_s25, %s353_s16  }
 0x334 PF: > { %s378_s4 = sand.u32 1, %s713_s12   ;;  %p1014_p12 = scmp.ne.s32.totalorder %s1003_s24, 0 }
 0x335   : > { %p1015_p0 = scmp.ge.s32.totalorder %s725_s15, 2  ;;  %s379_s11 = scalar_lea.sflag [#allocation4], %s378_s4 }
 0x337   : > { %p522_p8 = pnand %p1015_p0, %p1014_p12 }
 0x339   : > { %708 = dma.done.wait (!%p522_p8), %s379_s11, 128  }
 0x33a   : > { %710 = vsyncadd (!%p522_p8), %s379_s11, 4294967168  ;;  %s1016_s22 = sld [smem:[#allocation12_spill]]  ;;  %p19_p10 = scmp.ge.s32.totalorder %s776_s18, 4  }
 0x33b   : > { %s1017_s12 = smov %s717_s13  ;;  %s1018_s13 = smov %s721_s14 }
 0x33c   : > { %s1020_s15 = smov %s776_s18  ;;  %21 = sbr.rel (!%p19_p10) target bundleno = 10 (0xa), region = 101 }
 0x340   : > { %s1019_s14 = smov %s1016_s22 }
 0x343   :  { %384 = vsyncpa [#allocation3], 1 }
 0x344   :  { %386 = vsyncpa [#allocation3 + $0x1], 1 }
 0x345   :  { %387 = vsyncpa [#allocation6], 1 }
 0x346   :  { %389 = vsyncpa [#allocation6 + $0x1], 1 }
 0x347   :  { %390 = vsyncpa [#allocation4], 1 }
 0x348   :  { %392 = vsyncpa [#allocation4 + $0x1], 1 }

</bundles_post_ra>
